<compile_context>
chip_gen: v5e
topology: v5e:2x2
jax: 0.10.0
libtpu: 0.0.40
codegen_flags: <defaults>
</compile_context>

<pallas_src>
import functools

import jax
import jax.numpy as jnp
from jax.experimental import pallas as pl
from jax.experimental.pallas import tpu as pltpu


def _ceil_to(n, m):
    return ((n + m - 1) // m) * m


# ---------------------------------------------------------------------------
# Stage 1 kernel: feature transform  h = dropout(x) @ W   (h stored as bf16)
# ---------------------------------------------------------------------------
def _transform_kernel(x_ref, mask_ref, w_ref, h_ref, *, inv_keep):
    # Inverted dropout (bf16 mask in {0,1}, kept entries scaled by 1/(1-p))
    # fused with the MXU feature transform; accumulate f32, store bf16.
    xd = x_ref[...] * (mask_ref[...].astype(jnp.float32) * inv_keep)
    h = jnp.dot(xd, w_ref[...], preferred_element_type=jnp.float32)
    h_ref[...] = h.astype(h_ref.dtype)


# ---------------------------------------------------------------------------
# Stage 2 kernels: neighbourhood aggregation  out = adj @ h + b
#   bf16 adj x bf16 h -> f32 accumulation directly into the resident output
#   block; bias added once at finalize.
# ---------------------------------------------------------------------------
def _aggregate_resident_kernel(adj_ref, h_ref, b_ref, o_ref, *, tk):
    # h is fully VMEM-resident (constant index_map => DMA'd once for the whole
    # grid); slice the current k-block inside the kernel.
    k = pl.program_id(1)

    @pl.when(k == 0)
    def _init():
        o_ref[...] = jnp.zeros_like(o_ref)

    start = pl.multiple_of(k * tk, tk)
    h_blk = h_ref[pl.ds(start, tk), :]
    o_ref[...] += jnp.dot(adj_ref[...], h_blk, preferred_element_type=jnp.float32)

    @pl.when(k == pl.num_programs(1) - 1)
    def _finalize():
        o_ref[...] += b_ref[...]


def _aggregate_tiled_kernel(adj_ref, h_ref, b_ref, o_ref):
    # Fallback when h does not fit VMEM-resident: h re-streamed per row tile.
    k = pl.program_id(1)

    @pl.when(k == 0)
    def _init():
        o_ref[...] = jnp.zeros_like(o_ref)

    o_ref[...] += jnp.dot(adj_ref[...], h_ref[...],
                          preferred_element_type=jnp.float32)

    @pl.when(k == pl.num_programs(1) - 1)
    def _finalize():
        o_ref[...] += b_ref[...]


def gcn_conv(x, adj, w, b, *, p=0.1, key=None):
    """x: (N, in_dim) f32, adj: (N, N) dense adjacency (caller pre-normalizes
    if desired), w: (in_dim, out_dim) f32, b: (out_dim,) f32 -> (N, out_dim) f32."""
    N, in_dim = x.shape
    out_dim = w.shape[1]

    # --- Tile plan ---------------------------------------------------------
    # tk (reduction / adj-column tile) up to 1024, tm (row tile) up to 512:
    # 512x1024 bf16 adj tile = 1 MiB per buffer (2 MiB double-buffered), well
    # past the ~0.35 us per-grid-step overhead and inside every generation's
    # VMEM budget.  Rows / cols padded independently so padding waste stays
    # < one tile on each axis.
    n128 = _ceil_to(N, 128)
    tk = min(1024, n128)
    tm = min(512, tk)
    n_rows_pad = _ceil_to(N, tm)   # adj rows / out rows
    n_cols_pad = _ceil_to(N, tk)   # adj cols / h rows
    in_pad = _ceil_to(in_dim, 128)
    out_pad = _ceil_to(out_dim, 128)   # lane-dense output stores

    f32, bf16 = jnp.float32, jnp.bfloat16

    # TODO(synk): for an end-to-end win the caller should hand us adj already
    # in bf16 (and pre-padded); the pad+cast below is an extra O(N^2) XLA pass.
    # bf16 is exact for 0/1 adjacency; degree-normalized weights are rounded to
    # ~3 significant digits (acceptable for GCN).  On v7x, fp8 adj is an option
    # for unnormalized 0/1 graphs.
    x_p = jnp.zeros((n_cols_pad, in_pad), f32).at[:N, :in_dim].set(x.astype(f32))
    adj_p = jnp.zeros((n_rows_pad, n_cols_pad), bf16).at[:N, :N].set(adj.astype(bf16))
    w_p = jnp.zeros((in_pad, out_pad), f32).at[:in_dim, :out_dim].set(w.astype(f32))
    b_p = jnp.zeros((1, out_pad), f32).at[0, :out_dim].set(b.astype(f32))

    # Dropout mask (bf16 {0,1}; training semantics, deterministic per key).
    # TODO(synk): drawing the mask in-kernel with pltpu.prng_seed /
    # prng_random_bits would remove this HBM stream entirely; kept in the
    # wrapper (as bf16, half the f32 bytes) for robustness.
    if p > 0.0:
        if key is None:
            key = jax.random.PRNGKey(0)   # NOTE: identical dropout across calls
        mask = jax.random.bernoulli(key, 1.0 - p, (n_cols_pad, in_pad)).astype(bf16)
        inv_keep = 1.0 / (1.0 - p)
    else:
        mask = jnp.ones((n_cols_pad, in_pad), bf16)
        inv_keep = 1.0

    # --- Stage 1: h = dropout(x) @ W  (bf16 output, computed once) ----------
    # Stage-1 tiling decoupled from stage-2 tm; tm1 chosen so it divides
    # n_cols_pad (n_cols_pad is a multiple of tk).
    tm1 = 512 if tk >= 1024 else tk
    s1_bytes = (2 * tm1 * in_pad * 4          # x tiles (double-buffered)
                + 2 * tm1 * in_pad * 2        # mask tiles (bf16)
                + 2 * in_pad * out_pad * 4    # w
                + 2 * tm1 * out_pad * 2)      # h out tiles (bf16)
    s1_limit = min(max(32 << 20, 2 * s1_bytes), 64 << 20)

    h = pl.pallas_call(
        functools.partial(_transform_kernel, inv_keep=float(inv_keep)),
        out_shape=jax.ShapeDtypeStruct((n_cols_pad, out_pad), bf16),
        grid_spec=pltpu.PrefetchScalarGridSpec(
            num_scalar_prefetch=0,
            grid=(n_cols_pad // tm1,),
            in_specs=[
                pl.BlockSpec((tm1, in_pad), lambda i: (i, 0)),
                pl.BlockSpec((tm1, in_pad), lambda i: (i, 0)),
                pl.BlockSpec((in_pad, out_pad), lambda i: (0, 0)),
            ],
            out_specs=pl.BlockSpec((tm1, out_pad), lambda i: (i, 0)),
        ),
        compiler_params=pltpu.CompilerParams(
            dimension_semantics=("parallel",),
            vmem_limit_bytes=int(s1_limit)),
    )(x_p, mask, w_p)

    # --- Stage 2: out = adj @ h + b  (tiled over (i, k)) --------------------
    # h kept fully VMEM-resident when it fits (<=16 MiB bf16), eliminating the
    # (n_rows_pad/tm)x re-read from HBM; otherwise fall back to per-k tiles.
    # TODO(synk): for real sparse graphs, add block-sparsity skipping of zero
    # adj tiles via scalar-prefetched per-row block lists + data-dependent
    # index_map (MoE-group pattern) -- a pl.when guard alone skips MXU work but
    # not the DMA.
    h_bytes = n_cols_pad * out_pad * 2
    h_resident = h_bytes <= (16 << 20)

    if h_resident:
        kernel = functools.partial(_aggregate_resident_kernel, tk=tk)
        h_spec = pl.BlockSpec((n_cols_pad, out_pad), lambda i, k: (0, 0))
        h_vmem = h_bytes
    else:
        kernel = _aggregate_tiled_kernel
        h_spec = pl.BlockSpec((tk, out_pad), lambda i, k: (k, 0))
        h_vmem = 2 * tk * out_pad * 2

    s2_bytes = (2 * tm * tk * 2               # adj tiles (bf16, double-buffered)
                + h_vmem                      # h (resident or tiled)
                + 2 * tm * out_pad * 4        # output block (f32)
                + 2 * out_pad * 4)            # bias
    s2_limit = min(max(32 << 20, 2 * s2_bytes), 64 << 20)

    out_p = pl.pallas_call(
        kernel,
        out_shape=jax.ShapeDtypeStruct((n_rows_pad, out_pad), f32),
        grid_spec=pltpu.PrefetchScalarGridSpec(
            num_scalar_prefetch=0,
            grid=(n_rows_pad // tm, n_cols_pad // tk),
            in_specs=[
                pl.BlockSpec((tm, tk), lambda i, k: (i, k)),    # adj tile (bf16)
                h_spec,                                         # h (bf16)
                pl.BlockSpec((1, out_pad), lambda i, k: (0, 0)),  # bias
            ],
            out_specs=pl.BlockSpec((tm, out_pad), lambda i, k: (i, 0)),
        ),
        compiler_params=pltpu.CompilerParams(
            dimension_semantics=("parallel", "arbitrary"),
            vmem_limit_bytes=int(s2_limit)),
    )(adj_p, h, b_p)

    return out_p[:N, :out_dim]


def init_params(key, in_dim, out_dim):
    # Matches nn.init.xavier_uniform_(w); b is zero-initialized.
    bound = (6.0 / (in_dim + out_dim)) ** 0.5
    w = jax.random.uniform(key, (in_dim, out_dim), jnp.float32, -bound, bound)
    b = jnp.zeros((out_dim,), jnp.float32)
    return w, b


if __name__ == "__main__":
    N, in_dim, out_dim, p = 16, 32, 64, 0.1

    key = jax.random.PRNGKey(0)
    kx, kadj, kw, kdrop = jax.random.split(key, 4)

    x = jax.random.normal(kx, (N, in_dim), jnp.float32)
    # Random sparse-ish adjacency (binary, with self loops), kept dense.
    # NOTE: no D^-1/2 A D^-1/2 normalization applied -- matches
    # torch.sparse.mm(adj, h) semantics; caller pre-normalizes adj if desired.
    adj = (jax.random.uniform(kadj, (N, N)) < 0.2).astype(jnp.float32)
    adj = jnp.maximum(adj, jnp.eye(N, dtype=jnp.float32))

    w, b = init_params(kw, in_dim, out_dim)

    # Correctness check against a pure-JAX f32 reference with dropout disabled
    # (looser tolerance: adj and h travel as bf16).
    out_nodrop = gcn_conv(x, adj, w, b, p=0.0)
    ref = adj @ (x @ w) + b[None, :]
    assert jnp.allclose(out_nodrop, ref, atol=2e-2, rtol=2e-2), "mismatch vs reference"

    out = gcn_conv(x, adj, w, b, p=p, key=kdrop)
    jax.block_until_ready(out)
    assert out.shape == (N, out_dim) and out.dtype == jnp.float32
    print("KERNEL_OK")
</pallas_src>

<mosaic_0001>
module attributes {stable_mosaic.version = 11 : i64} {
  func.func @_transform_kernel(%arg0: i32, %arg1: memref<128x128xf32, #tpu.memory_space<vmem>>, %arg2: memref<128x128xbf16, #tpu.memory_space<vmem>>, %arg3: memref<128x128xf32, #tpu.memory_space<vmem>>, %arg4: memref<128x128xbf16, #tpu.memory_space<vmem>>) attributes {dimension_semantics = [#tpu.dimension_semantics<parallel>], iteration_bounds = array<i64: 1>, scalar_prefetch = 0 : i64, scratch_operands = 0 : i64, tpu.core_type = #tpu.core_type<tc>, window_params = [{transform_indices = @transform_0, window_bounds = array<i64: 128, 128>}, {transform_indices = @transform_1, window_bounds = array<i64: 128, 128>}, {pipeline_mode = #tpu.pipeline_mode<synchronous>, transform_indices = @transform_2, window_bounds = array<i64: 128, 128>}, {transform_indices = @transform_3, window_bounds = array<i64: 128, 128>}]} {
    %c0 = arith.constant 0 : index
    %c0_0 = arith.constant 0 : index
    %0 = vector.load %arg1[%c0, %c0_0] : memref<128x128xf32, #tpu.memory_space<vmem>>, vector<128x128xf32>
    %c0_1 = arith.constant 0 : index
    %c0_2 = arith.constant 0 : index
    %1 = vector.load %arg2[%c0_1, %c0_2] : memref<128x128xbf16, #tpu.memory_space<vmem>>, vector<128x128xbf16>
    %2 = arith.extf %1 : vector<128x128xbf16> to vector<128x128xf32>
    %cst = arith.constant 1.000000e+00 : f32
    %3 = vector.broadcast %cst : f32 to vector<128x128xf32>
    %4 = arith.mulf %2, %3 : vector<128x128xf32>
    %5 = arith.mulf %0, %4 : vector<128x128xf32>
    %c0_3 = arith.constant 0 : index
    %c0_4 = arith.constant 0 : index
    %6 = vector.load %arg3[%c0_3, %c0_4] : memref<128x128xf32, #tpu.memory_space<vmem>>, vector<128x128xf32>
    %cst_5 = arith.constant dense<0.000000e+00> : vector<128x128xf32>
    %7 = tpu.matmul %5, %6, %cst_5 {dimension_numbers = #tpu.dot_dimension_numbers<[1], [0], [0], [1], [0, 0, 1, 1], [], []>} : vector<128x128xf32>, vector<128x128xf32>, vector<128x128xf32> -> vector<128x128xf32>
    %8 = arith.truncf %7 : vector<128x128xf32> to vector<128x128xbf16>
    %c0_6 = arith.constant 0 : index
    %c0_7 = arith.constant 0 : index
    %9 = vector.load %arg4[%c0_6, %c0_7] : memref<128x128xbf16, #tpu.memory_space<vmem>>, vector<128x128xbf16>
    tpu.vector_store %arg4[%c0_6, %c0_7], %8 {strides = array<i32>} : memref<128x128xbf16, #tpu.memory_space<vmem>>, vector<128x128xbf16>,
    return
  }
  func.func @transform_0(%arg0: i32) -> (i32, i32) {
    %c0_i32 = arith.constant 0 : i32
    %c0_i32_0 = arith.constant 0 : i32
    return %arg0, %c0_i32 : i32, i32
  }
  func.func @transform_1(%arg0: i32) -> (i32, i32) {
    %c0_i32 = arith.constant 0 : i32
    %c0_i32_0 = arith.constant 0 : i32
    return %arg0, %c0_i32 : i32, i32
  }
  func.func @transform_2(%arg0: i32) -> (i32, i32) {
    %c0_i32 = arith.constant 0 : i32
    %c0_i32_0 = arith.constant 0 : i32
    %c0_i32_1 = arith.constant 0 : i32
    return %c0_i32, %c0_i32_0 : i32, i32
  }
  func.func @transform_3(%arg0: i32) -> (i32, i32) {
    %c0_i32 = arith.constant 0 : i32
    %c0_i32_0 = arith.constant 0 : i32
    return %arg0, %c0_i32 : i32, i32
  }
}

</mosaic_0001>

<bundles_post_ra>
// kernel: tpu_custom_call.1
= control target key start
LH: loop header
LB: loop body
LE: loop exit
PB: predicated region body
PF: predicated region fallthrough
CT: control target
= control target key end

     0   :  { %8 = vsyncpa [#allocation3], 0  ;;  %s549_s0 = inlined_call_operand.hbm [shape: f32[128,128], index: 0, kind: input, shape index: {}]   ;;  %s550_s1 = inlined_call_operand.hbm [shape: bf16[128,128], index: 1, kind: input, shape index: {}]   ;;  %s551_s2 = inlined_call_operand.hbm [shape: f32[128,128], index: 2, kind: input, shape index: {}]   ;;  %s552_s3 = inlined_call_operand.hbm [shape: bf16[128,128], index: 3, kind: output, shape index: {}]  }
   0x1   :  { %9 = vsyncpa [#allocation6], 0  ;;  %s28_s14 = sshll.u32 %s550_s1, 4  ;;  %s29_s14 = int_to_ptr.hbm [resolvable:$true] %s28_s14 }
   0x2   :  { %10 = vsyncpa [#allocation4], 0  ;;  %s503_s15 = smov [#allocation5]   ;;  %s15_s19 = sshll.u32 %s549_s0, 4  ;;  %s16_s19 = int_to_ptr.hbm [resolvable:$true] %s15_s19 }
   0x3   :  { %s30_s16 = sshll.u32 %s503_s15, 4  ;;  %s504_s20 = smov 64   ;;  %s31_s16 = int_to_ptr.vmem [resolvable:$true] %s30_s16 }
   0x4   :  { %s505_s21 = smov 4   ;;  %s506_s22 = smov [#allocation2]  }
   0x5   :  { %36 = dma.hbm_to_vmem [thread:$0]  %s29_s14, 1024, %s31_s16, [#allocation6], %s504_s20, %s504_s20, %s505_s21  }
   0x6   :  { %s17_s23 = sshll.u32 %s506_s22, 4  ;;  %s507_s1 = smov 128   ;;  %s18_s23 = int_to_ptr.vmem [resolvable:$true] %s17_s23 }
   0x7   :  { %s508_s24 = smov 8   ;;  %s41_s27 = sshll.u32 %s551_s2, 4  ;;  %s42_s27 = int_to_ptr.hbm [resolvable:$true] %s41_s27 }
   0x8   :  { %23 = dma.hbm_to_vmem [thread:$0]  %s16_s19, 2048, %s18_s23, [#allocation3], %s507_s1, %s507_s1, %s508_s24  }
   0x9   :  { %s509_s28 = smov [#allocation7]  }
   0xa   :  { %s43_s0 = sshll.u32 %s509_s28, 4  ;;  %s44_s0 = int_to_ptr.vmem [resolvable:$true] %s43_s0 }
   0xb   :  { %49 = dma.hbm_to_vmem [thread:$0]  %s42_s27, 2048, %s44_s0, [#allocation6], %s507_s1, %s507_s1, %s508_s24  }
   0xc   :  { %497 = dma.done.wait [#allocation3], 2048  }
   0xd   :  { %498 = vsyncadd [#allocation3], 4294965248 }
   0xe   :  { %499 = dma.done.wait [#allocation6], 3072  }
   0xf   :  { %500 = vsyncadd [#allocation6], 4294964224  ;;  %v141_v0 = vld [vmem:[#allocation7 + $0x78] sm:$0xff]  ;;  %v140_v1 = vld [vmem:[#allocation7 + $0x70] sm:$0xff]  ;;  %s510_s2 = smov [#allocation8]   ;;  %s245_s5 = sshll.u32 %s552_s3, 4  ;;  %s246_s5 = int_to_ptr.hbm [resolvable:$true] %s245_s5 }
  0x10   :  { %142 = vmatpush.msra.mxu0 %v141_v0  ;;  %345 = vmatpush.msra.mxu1 %v141_v0  ;;  %v139_v2 = vld [vmem:[#allocation7 + $0x68] sm:$0xff]  ;;  %v138_v3 = vld [vmem:[#allocation7 + $0x60] sm:$0xff]  ;;  %v137_v4 = vld [vmem:[#allocation7 + $0x58] sm:$0xff]  ;;  %s243_s29 = sshll.u32 %s510_s2, 4  ;;  %s244_s29 = int_to_ptr.vmem [resolvable:$true] %s243_s29 }
  0x11   :  { %346 = vmatpush.msra.mxu2 %v141_v0  ;;  %347 = vmatpush.msra.mxu3 %v141_v0  ;;  %v136_v5 = vld [vmem:[#allocation7 + $0x50] sm:$0xff]  ;;  %v135_v6 = vld [vmem:[#allocation7 + $0x48] sm:$0xff]  ;;  %v134_v7 = vld [vmem:[#allocation7 + $0x40] sm:$0xff] }
  0x12   :  { %143 = vmatpush.msra.mxu0 %v140_v1  ;;  %348 = vmatpush.msra.mxu1 %v140_v1  ;;  %v133_v8 = vld [vmem:[#allocation7 + $0x38] sm:$0xff]  ;;  %v132_v9 = vld [vmem:[#allocation7 + $0x30] sm:$0xff]  ;;  %v131_v10 = vld [vmem:[#allocation7 + $0x28] sm:$0xff] }
  0x13   :  { %349 = vmatpush.msra.mxu2 %v140_v1  ;;  %350 = vmatpush.msra.mxu3 %v140_v1  ;;  %v130_v11 = vld [vmem:[#allocation7 + $0x20] sm:$0xff]  ;;  %v129_v12 = vld [vmem:[#allocation7 + $0x18] sm:$0xff]  ;;  %v332_v14 = vld [vmem:[#allocation5 + $0x10] sm:$0xff]  }
  0x14   :  { %144 = vmatpush.msra.mxu0 %v139_v2  ;;  %351 = vmatpush.msra.mxu1 %v139_v2  ;;  %v260_v13 = vld [vmem:[#allocation5] sm:$0xff]   ;;  %v336_v16 = vld [vmem:[#allocation5 + $0x30] sm:$0xff]   ;;  %v269_v19 = vunpack.c.l.bf16 %v332_v14  ;;  %v127_v20 = vld [vmem:[#allocation7 + $0x8] sm:$0xff]  ;;  %v270_v33 = vunpack.c.h.bf16 %v332_v14 }
  0x15   :  { %352 = vmatpush.msra.mxu2 %v139_v2  ;;  %353 = vmatpush.msra.mxu3 %v139_v2  ;;  %v334_v15 = vld [vmem:[#allocation5 + $0x20] sm:$0xff]   ;;  %v128_v17 = vld [vmem:[#allocation7 + $0x10] sm:$0xff]  ;;  %v261_v18 = vunpack.c.l.bf16 %v260_v13  ;;  %v285_v24 = vunpack.c.l.bf16 %v336_v16  ;;  %v262_v32 = vunpack.c.h.bf16 %v260_v13  ;;  %v63_v34 = vld [vmem:[#allocation2 + $0x8] sm:$0xff]  ;;  %v286_v37 = vunpack.c.h.bf16 %v336_v16 }
  0x16   :  { %145 = vmatpush.msra.mxu0 %v138_v3  ;;  %354 = vmatpush.msra.mxu1 %v138_v3  ;;  %v62_v21 = vld [vmem:[#allocation2] sm:$0xff]  ;;  %v277_v23 = vunpack.c.l.bf16 %v334_v15  ;;  %v67_v35 = vld [vmem:[#allocation2 + $0x28] sm:$0xff]  ;;  %v278_v36 = vunpack.c.h.bf16 %v334_v15  ;;  %v333_v45 = vld [vmem:[#allocation5 + $0x18] sm:$0xff]  }
  0x17   :  { %355 = vmatpush.msra.mxu2 %v138_v3  ;;  %356 = vmatpush.msra.mxu3 %v138_v3  ;;  %v66_v22 = vld [vmem:[#allocation2 + $0x20] sm:$0xff]  ;;  %v110_v28 = vmul.f32 %v261_v18, %v62_v21  ;;  %v71_v38 = vld [vmem:[#allocation2 + $0x48] sm:$0xff]  ;;  %v111_v40 = vmul.f32 %v262_v32, %v63_v34  ;;  %v115_v41 = vmul.f32 %v270_v33, %v67_v35  ;;  %v337_v47 = vld [vmem:[#allocation5 + $0x38] sm:$0xff]   ;;  %v273_v49 = vunpack.c.l.bf16 %v333_v45 }
  0x18   :  { %146 = vmatpush.msra.mxu0 %v137_v4  ;;  %357 = vmatpush.msra.mxu1 %v137_v4  ;;  %v70_v25 = vld [vmem:[#allocation2 + $0x40] sm:$0xff]  ;;  %v114_v29 = vmul.f32 %v269_v19, %v66_v22  ;;  %v75_v39 = vld [vmem:[#allocation2 + $0x68] sm:$0xff]  ;;  %v119_v42 = vmul.f32 %v278_v36, %v71_v38  ;;  %v64_v50 = vld [vmem:[#allocation2 + $0x10] sm:$0xff]  ;;  %v289_v53 = vunpack.c.l.bf16 %v337_v47  ;;  %v274_v61 = vunpack.c.h.bf16 %v333_v45 }
  0x19   :  { %358 = vmatpush.msra.mxu2 %v137_v4  ;;  %359 = vmatpush.msra.mxu3 %v137_v4  ;;  %v74_v26 = vld [vmem:[#allocation2 + $0x60] sm:$0xff]  ;;  %v118_v30 = vmul.f32 %v277_v23, %v70_v25  ;;  %v123_v43 = vmul.f32 %v286_v37, %v75_v39  ;;  %v331_v44 = vld [vmem:[#allocation5 + $0x8] sm:$0xff]   ;;  %v68_v51 = vld [vmem:[#allocation2 + $0x30] sm:$0xff]  ;;  %v290_v1 = vunpack.c.h.bf16 %v337_v47 }
  0x1a   :  { %147 = vmatpush.msra.mxu0 %v136_v5  ;;  %360 = vmatpush.msra.mxu1 %v136_v5  ;;  %v126_v27 = vld [vmem:[#allocation7] sm:$0xff]  ;;  %v122_v31 = vmul.f32 %v285_v24, %v74_v26  ;;  %v335_v46 = vld [vmem:[#allocation5 + $0x28] sm:$0xff]   ;;  %v265_v48 = vunpack.c.l.bf16 %v331_v44  ;;  %v72_v54 = vld [vmem:[#allocation2 + $0x50] sm:$0xff]  ;;  %v116_v57 = vmul.f32 %v273_v49, %v68_v51  ;;  %v266_v60 = vunpack.c.h.bf16 %v331_v44 }
  0x1b   :  { %361 = vmatpush.msra.mxu2 %v136_v5  ;;  %362 = vmatpush.msra.mxu3 %v136_v5  ;;  %v281_v52 = vunpack.c.l.bf16 %v335_v46  ;;  %v76_v55 = vld [vmem:[#allocation2 + $0x70] sm:$0xff]  ;;  %v65_v62 = vld [vmem:[#allocation2 + $0x18] sm:$0xff]  ;;  %v282_v0 = vunpack.c.h.bf16 %v335_v46 }
  0x1c   :  { %148 = vmatpush.msra.mxu0 %v135_v6  ;;  %363 = vmatpush.msra.mxu1 %v135_v6  ;;  %v112_v56 = vmul.f32 %v265_v48, %v64_v50  ;;  %v124_v59 = vmul.f32 %v289_v53, %v76_v55  ;;  %v69_v63 = vld [vmem:[#allocation2 + $0x38] sm:$0xff]  ;;  %v113_v4 = vmul.f32 %v266_v60, %v65_v62 }
  0x1d   :  { %364 = vmatpush.msra.mxu2 %v135_v6  ;;  %365 = vmatpush.msra.mxu3 %v135_v6  ;;  %v120_v58 = vmul.f32 %v281_v52, %v72_v54  ;;  %v73_v2 = vld [vmem:[#allocation2 + $0x58] sm:$0xff]  ;;  %v117_v5 = vmul.f32 %v274_v61, %v69_v63 }
  0x1e   :  { %149 = vmatpush.msra.mxu0 %v134_v7  ;;  %366 = vmatpush.msra.mxu1 %v134_v7  ;;  %v77_v3 = vld [vmem:[#allocation2 + $0x78] sm:$0xff]  ;;  %v121_v6 = vmul.f32 %v282_v0, %v73_v2 }
  0x1f   :  { %367 = vmatpush.msra.mxu2 %v134_v7  ;;  %368 = vmatpush.msra.mxu3 %v134_v7  ;;  %v125_v7 = vmul.f32 %v290_v1, %v77_v3 }
  0x20   :  { %150 = vmatpush.msra.mxu0 %v133_v8  ;;  %369 = vmatpush.msra.mxu1 %v133_v8 }
  0x21   :  { %370 = vmatpush.msra.mxu2 %v133_v8  ;;  %371 = vmatpush.msra.mxu3 %v133_v8 }
  0x22   :  { %151 = vmatpush.msra.mxu0 %v132_v9  ;;  %372 = vmatpush.msra.mxu1 %v132_v9 }
  0x23   :  { %373 = vmatpush.msra.mxu2 %v132_v9  ;;  %374 = vmatpush.msra.mxu3 %v132_v9 }
  0x24   :  { %152 = vmatpush.msra.mxu0 %v131_v10  ;;  %375 = vmatpush.msra.mxu1 %v131_v10 }
  0x25   :  { %376 = vmatpush.msra.mxu2 %v131_v10  ;;  %377 = vmatpush.msra.mxu3 %v131_v10 }
  0x26   :  { %153 = vmatpush.msra.mxu0 %v130_v11  ;;  %378 = vmatpush.msra.mxu1 %v130_v11 }
  0x27   :  { %379 = vmatpush.msra.mxu2 %v130_v11  ;;  %380 = vmatpush.msra.mxu3 %v130_v11 }
  0x28   :  { %154 = vmatpush.msra.mxu0 %v129_v12  ;;  %381 = vmatpush.msra.mxu1 %v129_v12 }
  0x29   :  { %382 = vmatpush.msra.mxu2 %v129_v12  ;;  %383 = vmatpush.msra.mxu3 %v129_v12 }
  0x2a   :  { %155 = vmatpush.msra.mxu0 %v128_v17  ;;  %384 = vmatpush.msra.mxu1 %v128_v17 }
  0x2b   :  { %385 = vmatpush.msra.mxu2 %v128_v17  ;;  %386 = vmatpush.msra.mxu3 %v128_v17 }
  0x2c   :  { %156 = vmatpush.msra.mxu0 %v127_v20  ;;  %387 = vmatpush.msra.mxu1 %v127_v20 }
  0x2d   :  { %388 = vmatpush.msra.mxu2 %v127_v20  ;;  %389 = vmatpush.msra.mxu3 %v127_v20 }
  0x2e   :  { %157 = vmatpush.msra.mxu0 %v126_v27  ;;  %390 = vmatpush.msra.mxu1 %v126_v27 }
  0x2f   :  { %391 = vmatpush.msra.mxu2 %v126_v27  ;;  %392 = vmatpush.msra.mxu3 %v126_v27 }
  0x30   :  { %158 = vmatmul.f32.vlgmr.msra.gmra.mxu0 %v110_v28  ;;  %170 = vmatmul.f32.vlgmr.msra.gmra.mxu1 %v114_v29 }
  0x31   :  { %182 = vmatmul.f32.vlgmr.msra.gmra.mxu2 %v118_v30  ;;  %194 = vmatmul.f32.vlgmr.msra.gmra.mxu3 %v122_v31 }
  0x38   :  { %161 = vmatmul.f32.gmra.mxu0 %v111_v40  ;;  %173 = vmatmul.f32.gmra.mxu1 %v115_v41 }
  0x39   :  { %185 = vmatmul.f32.gmra.mxu2 %v119_v42  ;;  %197 = vmatmul.f32.gmra.mxu3 %v123_v43 }
  0x40   :  { %164 = vmatmul.f32.gmra.mxu0 %v112_v56  ;;  %176 = vmatmul.f32.gmra.mxu1 %v116_v57 }
  0x41   :  { %188 = vmatmul.f32.gmra.mxu2 %v120_v58  ;;  %200 = vmatmul.f32.gmra.mxu3 %v124_v59 }
  0x48   :  { %167 = vmatmul.f32.gmra.mxu0 %v113_v4  ;;  %179 = vmatmul.f32.gmra.mxu1 %v117_v5 }
  0x49   :  { %191 = vmatmul.f32.gmra.mxu2 %v121_v6  ;;  %203 = vmatmul.f32.gmra.mxu3 %v125_v7 }
  0xad   :  { %v159_v8 = vpop.f32.mrf.mxu0  ;;  %v171_v9 = vpop.f32.mrf.mxu1 }
  0xb4   :  { %v183_v10 = vpop.f32.mrf.mxu2  ;;  %v195_v11 = vpop.f32.mrf.mxu3 }
  0xb5   :  { %v162_v12 = vpop.f32.mrf.mxu0  ;;  %v174_v13 = vpop.f32.mrf.mxu1 }
  0xb6   :  { %v294_v14 = vpack.c.bf16 %v162_v12, %v159_v8  ;;  %v304_v15 = vpack.c.bf16 %v174_v13, %v171_v9 }
  0xb8   :  { %295 = vst [vmem:[#allocation8] sm:$0xff] %v294_v14  }
  0xb9   :  { %339 = vst [vmem:[#allocation8 + $0x10] sm:$0xff] %v304_v15  }
  0xbc   :  { %v186_v16 = vpop.f32.mrf.mxu2  ;;  %v198_v17 = vpop.f32.mrf.mxu3 }
  0xbd   :  { %v314_v18 = vpack.c.bf16 %v186_v16, %v183_v10  ;;  %v324_v19 = vpack.c.bf16 %v198_v17, %v195_v11  ;;  %v165_v20 = vpop.f32.mrf.mxu0  ;;  %v177_v21 = vpop.f32.mrf.mxu1 }
  0xbf   :  { %341 = vst [vmem:[#allocation8 + $0x20] sm:$0xff] %v314_v18  }
  0xc0   :  { %343 = vst [vmem:[#allocation8 + $0x30] sm:$0xff] %v324_v19  }
  0xc4   :  { %v189_v22 = vpop.f32.mrf.mxu2  ;;  %v201_v23 = vpop.f32.mrf.mxu3 }
  0xc5   :  { %v168_v24 = vpop.f32.mrf.mxu0  ;;  %v180_v25 = vpop.f32.mrf.mxu1 }
  0xc6   :  { %v299_v26 = vpack.c.bf16 %v168_v24, %v165_v20  ;;  %v309_v27 = vpack.c.bf16 %v180_v25, %v177_v21 }
  0xc8   :  { %338 = vst [vmem:[#allocation8 + $0x8] sm:$0xff] %v299_v26  }
  0xc9   :  { %340 = vst [vmem:[#allocation8 + $0x18] sm:$0xff] %v309_v27  }
  0xcc   :  { %v192_v28 = vpop.f32.mrf.mxu2  ;;  %v204_v29 = vpop.f32.mrf.mxu3 }
  0xcd   :  { %v319_v30 = vpack.c.bf16 %v192_v28, %v189_v22  ;;  %v329_v31 = vpack.c.bf16 %v204_v29, %v201_v23 }
  0xcf   :  { %342 = vst [vmem:[#allocation8 + $0x28] sm:$0xff] %v319_v30  }
  0xd0   :  { %344 = vst [vmem:[#allocation8 + $0x38] sm:$0xff] %v329_v31  }
  0xd1   :  { %251 = dma.vmem_to_hbm [thread:$0]  %s244_s29, 1024, %s246_s5, [#allocation4], %s504_s20, %s504_s20, %s505_s21  }
  0xd2   :  { %501 = dma.done.wait [#allocation4], 1024  }
  0xd3   :  { %502 = vsyncadd [#allocation4], 4294966272 }
  0xd4   :  { %256 = vsyncpa [#allocation3], 1 }
  0xd5   :  { %257 = vsyncpa [#allocation6], 1 }
  0xd6   :  { %258 = vsyncpa [#allocation4], 1 }

</bundles_post_ra>
